<compile_context>
chip_gen: v7x
topology: tpu7x:2x2x1
jax: 0.10.0
libtpu: 0.0.40
codegen_flags: <defaults>
</compile_context>

<pallas_src>
import functools

import jax
import jax.numpy as jnp
from jax.experimental import pallas as pl
from jax.experimental.pallas import tpu as pltpu

HIDDEN = 256
LANE = 128
SUBLANE = 8


def _round_up(x, m):
    return (x + m - 1) // m * m


def actor_kernel(xt_ref, w1_ref, b1_ref, w2_ref, b2_ref, w3_ref, b3_ref,
                 o_ref, *, max_action):
    # xt arrives already in bf16 (cast in the wrapper). Single layer-1 matmul
    # (K zero-padded), f32 accumulation on the MXU, f32 epilogue on the VPU.
    h1 = (jnp.dot(xt_ref[...], w1_ref[...],
                  preferred_element_type=jnp.float32) + b1_ref[...])
    h1 = jnp.maximum(h1, 0.0)

    h2 = (jnp.dot(h1.astype(jnp.bfloat16), w2_ref[...],
                  preferred_element_type=jnp.float32) + b2_ref[...])
    h2 = jnp.maximum(h2, 0.0)

    a = (jnp.dot(h2.astype(jnp.bfloat16), w3_ref[...],
                 preferred_element_type=jnp.float32) + b3_ref[...])
    # tanh goes to the EUP; padded output lanes carry tanh(0) = 0.
    o_ref[...] = (max_action * jnp.tanh(a)).astype(o_ref.dtype)


def prepare_actor_params(params):
    """One-time conversion of f32 (in, out) params into kernel-ready form:
    bf16 weights, W1 zero-padded to a 128-lane K, l3 padded to 128 out lanes."""
    w1, b1, w2, b2, w3, b3 = params
    state_dim = w1.shape[0]
    action_dim = w3.shape[1]
    k_pad = _round_up(state_dim, LANE)
    out_pad = _round_up(action_dim, LANE)
    w1p = jnp.pad(w1, ((0, k_pad - state_dim), (0, 0))).astype(jnp.bfloat16)
    w2b = w2.astype(jnp.bfloat16)
    w3p = jnp.pad(w3, ((0, 0), (0, out_pad - action_dim))).astype(jnp.bfloat16)
    b3p = jnp.pad(b3, ((0, 0), (0, out_pad - action_dim))).astype(jnp.float32)
    return (w1p, b1.astype(jnp.float32), w2b, b2.astype(jnp.float32),
            w3p, b3p, state_dim, action_dim)


def actor_forward(x, t, prepared, max_action, *, tile_b=2048,
                  out_dtype=jnp.float32):
    """x: (B, x_dim), t: (B, t_dim); returns (B, action_dim) in out_dtype."""
    w1p, b1, w2, b2, w3, b3, state_dim, action_dim = prepared
    B = x.shape[0]
    assert x.shape[1] + t.shape[1] == state_dim
    out_pad = w3.shape[1]
    k_full = w1p.shape[0]

    # ---- batch tiling -----------------------------------------------------
    # tb is always a multiple of 8 (BlockSpec (8,128) rule). For B >= 16 cap tb
    # so the grid has >= 2 steps and the "parallel" batch axis shards across
    # v7x's two TensorCores (no effect on single-TC v5e/v6e).
    tb = _round_up(min(tile_b, B), SUBLANE)
    if B >= 16:
        tb = min(tb, _round_up((B + 1) // 2, SUBLANE))
    b_pad = _round_up(B, tb)
    grid = (b_pad // tb,)

    # ---- layer-1 K layout ---------------------------------------------------
    # Small/medium B (latency regime): zero-pad K to 128 lanes -> one
    # lane-aligned MXU matmul. Very large B: keep K = state_dim (block last dim
    # equals the full array dim, which is legal) to avoid ~8x input DMA.
    k_used = k_full if B <= 4096 else state_dim
    w1_use = w1p if k_used == k_full else w1p[:k_used]

    xt = jnp.concatenate([x.astype(jnp.bfloat16), t.astype(jnp.bfloat16)],
                         axis=1)
    xt = jnp.pad(xt, ((0, b_pad - B), (0, k_used - state_dim)))

    # Weights/biases: constant block index -> DMA'd once, VMEM-resident across
    # all batch tiles.
    def resident(shape):
        return pl.BlockSpec(shape, lambda i: (0,) * len(shape))

    flops = 2 * b_pad * (k_used * HIDDEN + HIDDEN * HIDDEN + HIDDEN * out_pad)
    bytes_accessed = (
        (w1_use.size + w2.size + w3.size) * 2                 # bf16 weights
        + (b1.size + b2.size + b3.size) * 4                    # f32 biases
        + xt.size * 2                                          # bf16 input
        + b_pad * out_pad * jnp.dtype(out_dtype).itemsize)     # output
    cost = pl.CostEstimate(flops=flops,
                           transcendentals=b_pad * out_pad,    # tanh
                           bytes_accessed=int(bytes_accessed))

    kernel = functools.partial(actor_kernel, max_action=float(max_action))
    out = pl.pallas_call(
        kernel,
        out_shape=jax.ShapeDtypeStruct((b_pad, out_pad), out_dtype),
        grid=grid,
        in_specs=[
            pl.BlockSpec((tb, k_used), lambda i: (i, 0)),
            resident(w1_use.shape), resident(b1.shape),
            resident(w2.shape), resident(b2.shape),
            resident(w3.shape), resident(b3.shape),
        ],
        out_specs=pl.BlockSpec((tb, out_pad), lambda i: (i, 0)),
        compiler_params=pltpu.CompilerParams(
            dimension_semantics=("parallel",)),
        cost_estimate=cost,
    )(xt, w1_use, b1, w2, b2, w3, b3)

    # Padded batch rows contain tanh(b3) garbage and padded lanes are zero;
    # slice both off before handing the result downstream.
    return out[:B, :action_dim]


def init_actor_params(key, state_dim, action_dim, hidden=HIDDEN):
    """PyTorch nn.Linear-style init (U[-1/sqrt(fan_in), 1/sqrt(fan_in)]).
    Weights stored transposed: (in_features, out_features)."""
    def linear(k, fan_in, fan_out):
        kw, kb = jax.random.split(k)
        bound = 1.0 / jnp.sqrt(fan_in)
        w = jax.random.uniform(kw, (fan_in, fan_out), jnp.float32, -bound, bound)
        b = jax.random.uniform(kb, (1, fan_out), jnp.float32, -bound, bound)
        return w, b

    k1, k2, k3 = jax.random.split(key, 3)
    w1, b1 = linear(k1, state_dim, hidden)
    w2, b2 = linear(k2, hidden, hidden)
    w3, b3 = linear(k3, hidden, action_dim)
    return (w1, b1, w2, b2, w3, b3)


def actor_reference_f32(x, t, params, max_action):
    """Pure-JAX f32 reference (semantic spec, matches the PyTorch module)."""
    w1, b1, w2, b2, w3, b3 = params
    xt = jnp.concatenate([x, t], axis=1)
    h1 = jax.nn.relu(xt @ w1 + b1)
    h2 = jax.nn.relu(h1 @ w2 + b2)
    return max_action * jnp.tanh(h2 @ w3 + b3)


def actor_reference_bf16(x, t, params, max_action):
    """Pure-JAX reference matching the kernel's bf16-operand / f32-accum path."""
    w1, b1, w2, b2, w3, b3 = params
    bf = jnp.bfloat16
    xt = jnp.concatenate([x.astype(bf), t.astype(bf)], axis=1)
    h1 = jax.nn.relu(jnp.dot(xt, w1.astype(bf),
                             preferred_element_type=jnp.float32) + b1)
    h2 = jax.nn.relu(jnp.dot(h1.astype(bf), w2.astype(bf),
                             preferred_element_type=jnp.float32) + b2)
    a = jnp.dot(h2.astype(bf), w3.astype(bf),
                preferred_element_type=jnp.float32) + b3
    return max_action * jnp.tanh(a)


if __name__ == "__main__":
    # Small shapes: batch=8, x_dim=10, t_dim=6 -> state_dim=16, action_dim=8.
    batch, x_dim, t_dim, action_dim = 8, 10, 6, 8
    state_dim = x_dim + t_dim
    max_action = 2.0

    key = jax.random.PRNGKey(0)
    kx, kt, kp = jax.random.split(key, 3)
    x = jax.random.normal(kx, (batch, x_dim), jnp.float32)
    t = jax.random.normal(kt, (batch, t_dim), jnp.float32)
    params = init_actor_params(kp, state_dim, action_dim)
    prepared = prepare_actor_params(params)

    out = actor_forward(x, t, prepared, max_action)
    out = jax.block_until_ready(out)
    assert out.shape == (batch, action_dim)

    # Numerical check against a reference that follows the same bf16-operand /
    # f32-accumulation recipe (kernel matches this tightly), plus a loose
    # sanity check against the exact f32 spec.
    ref_bf16 = actor_reference_bf16(x, t, params, max_action)
    ref_f32 = actor_reference_f32(x, t, params, max_action)
    assert jnp.allclose(out, ref_bf16, atol=2e-2, rtol=2e-2), \
        "mismatch vs bf16-matched JAX reference"
    assert jnp.allclose(out, ref_f32, atol=1e-1, rtol=1e-1), \
        "mismatch vs f32 JAX reference"

    print("KERNEL_OK")
</pallas_src>

<mosaic_0001>
module attributes {stable_mosaic.version = 11 : i64} {
  func.func @actor_kernel(%arg0: i32, %arg1: memref<8x128xbf16, #tpu.memory_space<vmem>>, %arg2: memref<128x256xbf16, #tpu.memory_space<vmem>>, %arg3: memref<1x256xf32, #tpu.memory_space<vmem>>, %arg4: memref<256x256xbf16, #tpu.memory_space<vmem>>, %arg5: memref<1x256xf32, #tpu.memory_space<vmem>>, %arg6: memref<256x128xbf16, #tpu.memory_space<vmem>>, %arg7: memref<1x128xf32, #tpu.memory_space<vmem>>, %arg8: memref<8x128xf32, #tpu.memory_space<vmem>>) attributes {dimension_semantics = [#tpu.dimension_semantics<parallel>], iteration_bounds = array<i64: 1>, scalar_prefetch = 0 : i64, scratch_operands = 0 : i64, tpu.core_type = #tpu.core_type<tc>, window_params = [{transform_indices = @transform_0, window_bounds = array<i64: 8, 128>}, {pipeline_mode = #tpu.pipeline_mode<synchronous>, transform_indices = @transform_1, window_bounds = array<i64: 128, 256>}, {pipeline_mode = #tpu.pipeline_mode<synchronous>, transform_indices = @transform_2, window_bounds = array<i64: 1, 256>}, {pipeline_mode = #tpu.pipeline_mode<synchronous>, transform_indices = @transform_3, window_bounds = array<i64: 256, 256>}, {pipeline_mode = #tpu.pipeline_mode<synchronous>, transform_indices = @transform_4, window_bounds = array<i64: 1, 256>}, {pipeline_mode = #tpu.pipeline_mode<synchronous>, transform_indices = @transform_5, window_bounds = array<i64: 256, 128>}, {pipeline_mode = #tpu.pipeline_mode<synchronous>, transform_indices = @transform_6, window_bounds = array<i64: 1, 128>}, {transform_indices = @transform_7, window_bounds = array<i64: 8, 128>}]} {
    %c0 = arith.constant 0 : index
    %c0_0 = arith.constant 0 : index
    %0 = vector.load %arg1[%c0, %c0_0] : memref<8x128xbf16, #tpu.memory_space<vmem>>, vector<8x128xbf16>
    %c0_1 = arith.constant 0 : index
    %c0_2 = arith.constant 0 : index
    %1 = vector.load %arg2[%c0_1, %c0_2] : memref<128x256xbf16, #tpu.memory_space<vmem>>, vector<128x256xbf16>
    %cst = arith.constant dense<0.000000e+00> : vector<8x256xf32>
    %2 = tpu.matmul %0, %1, %cst {dimension_numbers = #tpu.dot_dimension_numbers<[1], [0], [0], [1], [0, 0, 1, 1], [], []>} : vector<8x128xbf16>, vector<128x256xbf16>, vector<8x256xf32> -> vector<8x256xf32>
    %c0_3 = arith.constant 0 : index
    %c0_4 = arith.constant 0 : index
    %3 = vector.load %arg3[%c0_3, %c0_4] : memref<1x256xf32, #tpu.memory_space<vmem>>, vector<1x256xf32>
    %4 = vector.broadcast %3 : vector<1x256xf32> to vector<8x256xf32>
    %5 = arith.addf %2, %4 : vector<8x256xf32>
    %cst_5 = arith.constant 0.000000e+00 : f32
    %6 = vector.broadcast %cst_5 : f32 to vector<8x256xf32>
    %7 = arith.maximumf %5, %6 : vector<8x256xf32>
    %8 = arith.truncf %7 : vector<8x256xf32> to vector<8x256xbf16>
    %c0_6 = arith.constant 0 : index
    %c0_7 = arith.constant 0 : index
    %9 = vector.load %arg4[%c0_6, %c0_7] : memref<256x256xbf16, #tpu.memory_space<vmem>>, vector<256x256xbf16>
    %cst_8 = arith.constant dense<0.000000e+00> : vector<8x256xf32>
    %10 = tpu.matmul %8, %9, %cst_8 {dimension_numbers = #tpu.dot_dimension_numbers<[1], [0], [0], [1], [0, 0, 1, 1], [], []>} : vector<8x256xbf16>, vector<256x256xbf16>, vector<8x256xf32> -> vector<8x256xf32>
    %c0_9 = arith.constant 0 : index
    %c0_10 = arith.constant 0 : index
    %11 = vector.load %arg5[%c0_9, %c0_10] : memref<1x256xf32, #tpu.memory_space<vmem>>, vector<1x256xf32>
    %12 = vector.broadcast %11 : vector<1x256xf32> to vector<8x256xf32>
    %13 = arith.addf %10, %12 : vector<8x256xf32>
    %cst_11 = arith.constant 0.000000e+00 : f32
    %14 = vector.broadcast %cst_11 : f32 to vector<8x256xf32>
    %15 = arith.maximumf %13, %14 : vector<8x256xf32>
    %16 = arith.truncf %15 : vector<8x256xf32> to vector<8x256xbf16>
    %c0_12 = arith.constant 0 : index
    %c0_13 = arith.constant 0 : index
    %17 = vector.load %arg6[%c0_12, %c0_13] : memref<256x128xbf16, #tpu.memory_space<vmem>>, vector<256x128xbf16>
    %cst_14 = arith.constant dense<0.000000e+00> : vector<8x128xf32>
    %18 = tpu.matmul %16, %17, %cst_14 {dimension_numbers = #tpu.dot_dimension_numbers<[1], [0], [0], [1], [0, 0, 1, 1], [], []>} : vector<8x256xbf16>, vector<256x128xbf16>, vector<8x128xf32> -> vector<8x128xf32>
    %c0_15 = arith.constant 0 : index
    %c0_16 = arith.constant 0 : index
    %19 = vector.load %arg7[%c0_15, %c0_16] : memref<1x128xf32, #tpu.memory_space<vmem>>, vector<1x128xf32>
    %20 = vector.broadcast %19 : vector<1x128xf32> to vector<8x128xf32>
    %21 = arith.addf %18, %20 : vector<8x128xf32>
    %22 = math.tanh %21 : vector<8x128xf32>
    %cst_17 = arith.constant 2.000000e+00 : f32
    %23 = vector.broadcast %cst_17 : f32 to vector<8x128xf32>
    %24 = arith.mulf %23, %22 : vector<8x128xf32>
    %c0_18 = arith.constant 0 : index
    %c0_19 = arith.constant 0 : index
    %25 = vector.load %arg8[%c0_18, %c0_19] : memref<8x128xf32, #tpu.memory_space<vmem>>, vector<8x128xf32>
    tpu.vector_store %arg8[%c0_18, %c0_19], %24 {strides = array<i32>} : memref<8x128xf32, #tpu.memory_space<vmem>>, vector<8x128xf32>,
    return
  }
  func.func @transform_0(%arg0: i32) -> (i32, i32) {
    %c0_i32 = arith.constant 0 : i32
    %c0_i32_0 = arith.constant 0 : i32
    return %arg0, %c0_i32 : i32, i32
  }
  func.func @transform_1(%arg0: i32) -> (i32, i32) {
    %c0_i32 = arith.constant 0 : i32
    %c0_i32_0 = arith.constant 0 : i32
    %c0_i32_1 = arith.constant 0 : i32
    return %c0_i32, %c0_i32_0 : i32, i32
  }
  func.func @transform_2(%arg0: i32) -> (i32, i32) {
    %c0_i32 = arith.constant 0 : i32
    %c0_i32_0 = arith.constant 0 : i32
    %c0_i32_1 = arith.constant 0 : i32
    return %c0_i32, %c0_i32_0 : i32, i32
  }
  func.func @transform_3(%arg0: i32) -> (i32, i32) {
    %c0_i32 = arith.constant 0 : i32
    %c0_i32_0 = arith.constant 0 : i32
    %c0_i32_1 = arith.constant 0 : i32
    return %c0_i32, %c0_i32_0 : i32, i32
  }
  func.func @transform_4(%arg0: i32) -> (i32, i32) {
    %c0_i32 = arith.constant 0 : i32
    %c0_i32_0 = arith.constant 0 : i32
    %c0_i32_1 = arith.constant 0 : i32
    return %c0_i32, %c0_i32_0 : i32, i32
  }
  func.func @transform_5(%arg0: i32) -> (i32, i32) {
    %c0_i32 = arith.constant 0 : i32
    %c0_i32_0 = arith.constant 0 : i32
    %c0_i32_1 = arith.constant 0 : i32
    return %c0_i32, %c0_i32_0 : i32, i32
  }
  func.func @transform_6(%arg0: i32) -> (i32, i32) {
    %c0_i32 = arith.constant 0 : i32
    %c0_i32_0 = arith.constant 0 : i32
    %c0_i32_1 = arith.constant 0 : i32
    return %c0_i32, %c0_i32_0 : i32, i32
  }
  func.func @transform_7(%arg0: i32) -> (i32, i32) {
    %c0_i32 = arith.constant 0 : i32
    %c0_i32_0 = arith.constant 0 : i32
    return %arg0, %c0_i32 : i32, i32
  }
}

</mosaic_0001>

<bundles_post_ra>
// kernel: tpu_custom_call.1
= control target key start
LH: loop header
LB: loop body
LE: loop exit
PB: predicated region body
PF: predicated region fallthrough
CT: control target
= control target key end

     0   :  { %12 = vsyncpa [#allocation3], 0  ;;  %s1109_s0 = inlined_call_operand.hbm [shape: bf16[8,128], index: 0, kind: input, shape index: {}]   ;;  %s1110_s1 = inlined_call_operand.hbm [shape: bf16[128,256], index: 1, kind: input, shape index: {}]   ;;  %s1111_s2 = inlined_call_operand.vmem [shape: f32[1,256], index: 2, kind: input, shape index: {}]   ;;  %s1112_s3 = inlined_call_operand.hbm [shape: bf16[256,256], index: 3, kind: input, shape index: {}]   ;;  %s1113_s4 = inlined_call_operand.vmem [shape: f32[1,256], index: 4, kind: input, shape index: {}]   ;;  %s1114_s5 = inlined_call_operand.hbm [shape: bf16[256,128], index: 5, kind: input, shape index: {}]   ;;  %s1115_s6 = inlined_call_operand.vmem [shape: f32[1,128], index: 6, kind: input, shape index: {}]   ;;  %s1116_s7 = inlined_call_operand.hbm [shape: f32[8,128], index: 7, kind: output, shape index: {}]  }
   0x1   :  { %13 = vsyncpa [#allocation6], 0 }
   0x2   :  { %14 = vsyncpa [#allocation9], 0 }
   0x3   :  { %15 = vsyncpa [#allocation4], 0  ;;  %s984_s24 = smov [#allocation5]   ;;  %s866_s28 = scalar_lea.hbm %s1110_s1, 2048 }
   0x4   :  { %s31_s25 = sshll.u32 %s984_s24, 4  ;;  %p867_p0 = scmp.ne.s32.totalorder %s1110_s1, %s866_s28  ;;  %s32_s25 = int_to_ptr.vmem [resolvable:$true] %s31_s25 }
   0x5   :  { %p870_p1 = scmp.lt.u32.totalorder %s866_s28, %s1110_s1 }
   0x7   :  { %p872_p2 = pnand %p870_p1, %p867_p0 }
   0x9   :  { %875 = shalt.err (!%p872_p2)
}
   0xa   :  { %s876_s10 = scalar_lea.vmem %s32_s25, 2048  ;;  %p881_p4 = scmp.lt.s32.totalorder %s32_s25, %s32_s25 }
   0xb   :  { %p877_p3 = scmp.ne.s32.totalorder %s32_s25, %s876_s10  ;;  %p882_p5 = scmp.lt.s32.totalorder %s876_s10, %s876_s10 }
   0xd   :  { %p883_p6 = por %p882_p5, %p881_p4 }
   0xf   :  { %p884_p7 = pnand %p883_p6, %p877_p3 }
  0x11   :  { %887 = shalt.err (!%p884_p7)
}
  0x12   :  { %s985_s11 = smov 128   ;;  %s986_s12 = smov 8  }
  0x13   :  { %37 = dma.hbm_to_vmem [thread:$0]  %s1110_s1, 2048, %s32_s25, [#allocation6], %s985_s11, %s985_s11, %s986_s12  }
  0x14   :  { %s987_s15 = smov [#allocation2]   ;;  %s988_s17 = smov [#allocation7]  }
  0x15   :  { %s22_s16 = sshll.u32 %s987_s15, 4  ;;  %s45_s18 = sshll.u32 %s988_s17, 4  ;;  %s23_s16 = int_to_ptr.vmem [resolvable:$true] %s22_s16  ;;  %s46_s18 = int_to_ptr.vmem [resolvable:$true] %s45_s18 }
  0x16   :  { %s888_s21 = scalar_lea.hbm %s1109_s0, 64 }
  0x17   :  { %p889_p8 = scmp.ne.s32.totalorder %s1109_s0, %s888_s21  ;;  %p892_p9 = scmp.lt.u32.totalorder %s888_s21, %s1109_s0 }
  0x19   :  { %p894_p10 = pnand %p892_p9, %p889_p8 }
  0x1b   :  { %897 = shalt.err (!%p894_p10)
}
  0x1c   :  { %s898_s1 = scalar_lea.vmem %s23_s16, 64  ;;  %p903_p12 = scmp.lt.s32.totalorder %s23_s16, %s23_s16 }
  0x1d   :  { %p899_p11 = scmp.ne.s32.totalorder %s23_s16, %s898_s1  ;;  %p904_p13 = scmp.lt.s32.totalorder %s898_s1, %s898_s1 }
  0x1f   :  { %p905_p0 = por %p904_p13, %p903_p12 }
  0x21   :  { %p906_p1 = pnand %p905_p0, %p899_p11 }
  0x23   :  { %909 = shalt.err (!%p906_p1)
}
  0x24   :  { %25 = dma.hbm_to_vmem [thread:$0]  %s1109_s0, 64, %s23_s16, [#allocation3]  }
  0x25   :  { %s910_s30 = scalar_lea.hbm %s1112_s3, 4096 }
  0x26   :  { %p911_p2 = scmp.ne.s32.totalorder %s1112_s3, %s910_s30  ;;  %p914_p3 = scmp.lt.u32.totalorder %s910_s30, %s1112_s3 }
  0x28   :  { %p916_p4 = pnand %p914_p3, %p911_p2 }
  0x2a   :  { %919 = shalt.err (!%p916_p4)
}
  0x2b   :  { %s920_s14 = scalar_lea.vmem %s46_s18, 4096  ;;  %p925_p6 = scmp.lt.s32.totalorder %s46_s18, %s46_s18 }
  0x2c   :  { %p921_p5 = scmp.ne.s32.totalorder %s46_s18, %s920_s14  ;;  %p926_p7 = scmp.lt.s32.totalorder %s920_s14, %s920_s14 }
  0x2e   :  { %p927_p8 = por %p926_p7, %p925_p6 }
  0x30   :  { %p928_p9 = pnand %p927_p8, %p921_p5 }
  0x32   :  { %931 = shalt.err (!%p928_p9)
}
  0x33   :  { %51 = dma.hbm_to_vmem [thread:$0]  %s1112_s3, 4096, %s46_s18, [#allocation6], %s985_s11, %s985_s11, %s986_s12  }
  0x34   :  { %s989_s16 = smov [#allocation8]   ;;  %s932_s21 = scalar_lea.hbm %s1114_s5, 2048 }
  0x35   :  { %s59_s17 = sshll.u32 %s989_s16, 4  ;;  %p933_p10 = scmp.ne.s32.totalorder %s1114_s5, %s932_s21  ;;  %s60_s17 = int_to_ptr.vmem [resolvable:$true] %s59_s17 }
  0x36   :  { %p936_p11 = scmp.lt.u32.totalorder %s932_s21, %s1114_s5 }
  0x38   :  { %p938_p12 = pnand %p936_p11, %p933_p10 }
  0x3a   :  { %941 = shalt.err (!%p938_p12)
}
  0x3b   :  { %s942_s1 = scalar_lea.vmem %s60_s17, 2048  ;;  %p947_p0 = scmp.lt.s32.totalorder %s60_s17, %s60_s17 }
  0x3c   :  { %p943_p13 = scmp.ne.s32.totalorder %s60_s17, %s942_s1  ;;  %p948_p1 = scmp.lt.s32.totalorder %s942_s1, %s942_s1 }
  0x3e   :  { %p949_p2 = por %p948_p1, %p947_p0 }
  0x40   :  { %p950_p3 = pnand %p949_p2, %p943_p13 }
  0x42   :  { %953 = shalt.err (!%p950_p3)
}
  0x43   :  { %s990_s3 = smov 64   ;;  %s991_s11 = smov 4  }
  0x44   :  { %65 = dma.hbm_to_vmem [thread:$0]  %s1114_s5, 2048, %s60_s17, [#allocation9], %s990_s3, %s990_s3, %s991_s11  }
  0x45   :  { %976 = dma.done.wait [#allocation3], 64  }
  0x46   :  { %977 = vsyncadd [#allocation3], 4294967232 }
  0x47   :  { %978 = dma.done.wait [#allocation6], 6144  }
  0x48   :  { %979 = vsyncadd [#allocation6], 4294961152 }
  0x49   :  { %980 = dma.done.wait [#allocation9], 2048  }
  0x4a   :  { %981 = vsyncadd [#allocation9], 4294965248  ;;  %v992_v0 = vmov 0   ;;  %v776_v1 = vld [vmem:[#allocation5 + $0x4] ss:$8 sps:$4 sm:$0xff]   ;;  %v852_v54 = vld [vmem:[#allocation8 + $0x50] sm:$0xff]   ;;  %v100_v62 = vlaneseq }
  0x4b   :  { %222 = vmatprep.mubr.bf16.mxu0 %v992_v0  ;;  %v778_v2 = vld [vmem:[#allocation5] ss:$8 sps:$4 sm:$0xff]   ;;  %190 = vmatprep.subr.bf16.mxu0 %v776_v1  ;;  %v779_v3 = vld [vmem:[#allocation5 + $0x14] ss:$8 sps:$4 sm:$0xff]   ;;  %v781_v4 = vld [vmem:[#allocation5 + $0x10] ss:$8 sps:$4 sm:$0xff]  }
  0x4c   :  { %191 = vmatpush1.bf16.msra.mxu0 %v778_v2  ;;  %v782_v5 = vld [vmem:[#allocation5 + $0x24] ss:$8 sps:$4 sm:$0xff]   ;;  %v784_v6 = vld [vmem:[#allocation5 + $0x20] ss:$8 sps:$4 sm:$0xff]   ;;  %v785_v7 = vld [vmem:[#allocation5 + $0x34] ss:$8 sps:$4 sm:$0xff]  }
  0x4d   :  { %192 = vmatprep.subr.bf16.mxu0 %v779_v3  ;;  %v787_v8 = vld [vmem:[#allocation5 + $0x30] ss:$8 sps:$4 sm:$0xff]   ;;  %v788_v9 = vld [vmem:[#allocation5 + $0x44] ss:$8 sps:$4 sm:$0xff]   ;;  %v802_v11 = vld [vmem:[#allocation7] ss:$8 sps:$4 sm:$0xff]  }
  0x4e   :  { %v800_v10 = vld [vmem:[#allocation7 + $0x4] ss:$8 sps:$4 sm:$0xff]   ;;  %v803_v12 = vld [vmem:[#allocation7 + $0x14] ss:$8 sps:$4 sm:$0xff]   ;;  %v790_v13 = vld [vmem:[#allocation5 + $0x40] ss:$8 sps:$4 sm:$0xff]  }
  0x4f   :  { %439 = vmatprep.subr.bf16.mxu1 %v800_v10  ;;  %v805_v14 = vld [vmem:[#allocation7 + $0x10] ss:$8 sps:$4 sm:$0xff]   ;;  %v806_v15 = vld [vmem:[#allocation7 + $0x24] ss:$8 sps:$4 sm:$0xff]   ;;  %v791_v16 = vld [vmem:[#allocation5 + $0x54] ss:$8 sps:$4 sm:$0xff]  }
  0x50   :  { %193 = vmatpush1.bf16.msra.mxu0 %v781_v4  ;;  %440 = vmatpush1.bf16.msra.mxu1 %v802_v11  ;;  %v793_v17 = vld [vmem:[#allocation5 + $0x50] ss:$8 sps:$4 sm:$0xff]   ;;  %v808_v18 = vld [vmem:[#allocation7 + $0x20] ss:$8 sps:$4 sm:$0xff]   ;;  %v809_v19 = vld [vmem:[#allocation7 + $0x34] ss:$8 sps:$4 sm:$0xff]  }
  0x51   :  { %194 = vmatprep.subr.bf16.mxu0 %v782_v5  ;;  %441 = vmatprep.subr.bf16.mxu1 %v803_v12  ;;  %v794_v20 = vld [vmem:[#allocation5 + $0x64] ss:$8 sps:$4 sm:$0xff]   ;;  %v796_v21 = vld [vmem:[#allocation5 + $0x60] ss:$8 sps:$4 sm:$0xff]   ;;  %v811_v22 = vld [vmem:[#allocation7 + $0x30] ss:$8 sps:$4 sm:$0xff]  }
  0x52   :  { %v812_v23 = vld [vmem:[#allocation7 + $0x44] ss:$8 sps:$4 sm:$0xff]   ;;  %v797_v24 = vld [vmem:[#allocation5 + $0x74] ss:$8 sps:$4 sm:$0xff]   ;;  %v799_v25 = vld [vmem:[#allocation5 + $0x70] ss:$8 sps:$4 sm:$0xff]  }
  0x53   :  { %v814_v26 = vld [vmem:[#allocation7 + $0x40] ss:$8 sps:$4 sm:$0xff]   ;;  %v815_v27 = vld [vmem:[#allocation7 + $0x54] ss:$8 sps:$4 sm:$0xff]   ;;  %v817_v29 = vld [vmem:[#allocation7 + $0x50] ss:$8 sps:$4 sm:$0xff]  }
  0x54   :  { %195 = vmatpush1.bf16.msra.mxu0 %v784_v6  ;;  %442 = vmatpush1.bf16.msra.mxu1 %v805_v14  ;;  %v81_v28 = vld [vmem:[#allocation2] sm:$0xf]  ;;  %v818_v30 = vld [vmem:[#allocation7 + $0x64] ss:$8 sps:$4 sm:$0xff]   ;;  %v820_v31 = vld [vmem:[#allocation7 + $0x60] ss:$8 sps:$4 sm:$0xff]  }
  0x55   :  { %196 = vmatprep.subr.bf16.mxu0 %v785_v7  ;;  %443 = vmatprep.subr.bf16.mxu1 %v806_v15  ;;  %v821_v32 = vld [vmem:[#allocation7 + $0x74] ss:$8 sps:$4 sm:$0xff]   ;;  %v823_v33 = vld [vmem:[#allocation7 + $0x70] ss:$8 sps:$4 sm:$0xff]   ;;  %v824_v34 = vld [vmem:[#allocation7 + $0x84] ss:$8 sps:$4 sm:$0xff]  }
  0x56   :  { %v826_v35 = vld [vmem:[#allocation7 + $0x80] ss:$8 sps:$4 sm:$0xff]   ;;  %v827_v36 = vld [vmem:[#allocation7 + $0x94] ss:$8 sps:$4 sm:$0xff]   ;;  %v829_v37 = vld [vmem:[#allocation7 + $0x90] ss:$8 sps:$4 sm:$0xff]  }
  0x57   :  { %v830_v38 = vld [vmem:[#allocation7 + $0xa4] ss:$8 sps:$4 sm:$0xff]   ;;  %v832_v39 = vld [vmem:[#allocation7 + $0xa0] ss:$8 sps:$4 sm:$0xff]   ;;  %v833_v40 = vld [vmem:[#allocation7 + $0xb4] ss:$8 sps:$4 sm:$0xff]  }
  0x58   :  { %197 = vmatpush1.bf16.msra.mxu0 %v787_v8  ;;  %444 = vmatpush1.bf16.msra.mxu1 %v808_v18  ;;  %v835_v41 = vld [vmem:[#allocation7 + $0xb0] ss:$8 sps:$4 sm:$0xff]   ;;  %v836_v42 = vld [vmem:[#allocation7 + $0xc4] ss:$8 sps:$4 sm:$0xff]   ;;  %v838_v43 = vld [vmem:[#allocation7 + $0xc0] ss:$8 sps:$4 sm:$0xff]  }
  0x59   :  { %198 = vmatprep.subr.bf16.mxu0 %v788_v9  ;;  %445 = vmatprep.subr.bf16.mxu1 %v809_v19  ;;  %v839_v44 = vld [vmem:[#allocation7 + $0xd4] ss:$8 sps:$4 sm:$0xff]   ;;  %v841_v45 = vld [vmem:[#allocation7 + $0xd0] ss:$8 sps:$4 sm:$0xff]   ;;  %v842_v46 = vld [vmem:[#allocation7 + $0xe4] ss:$8 sps:$4 sm:$0xff]  }
  0x5a   :  { %v844_v47 = vld [vmem:[#allocation7 + $0xe0] ss:$8 sps:$4 sm:$0xff]   ;;  %v845_v48 = vld [vmem:[#allocation7 + $0xf4] ss:$8 sps:$4 sm:$0xff]   ;;  %v847_v49 = vld [vmem:[#allocation7 + $0xf0] ss:$8 sps:$4 sm:$0xff]  }
  0x5b   :  { %v848_v50 = vld [vmem:[#allocation8 + $0x40] sm:$0xff]   ;;  %v850_v52 = vld [vmem:[#allocation8 + $0x48] sm:$0xff]   ;;  %v853_v55 = vld [vmem:[#allocation8 + $0x10] sm:$0xff]   ;;  %v101_v63 = vshrl.u32 %v100_v62, 7 }
  0x5c   :  { %199 = vmatpush1.bf16.msra.mxu0 %v790_v13  ;;  %446 = vmatpush1.bf16.msra.mxu1 %v811_v22  ;;  %v849_v51 = vld [vmem:[#allocation8] sm:$0xff]   ;;  %v851_v53 = vld [vmem:[#allocation8 + $0x8] sm:$0xff]   ;;  %v854_v56 = vld [vmem:[#allocation8 + $0x58] sm:$0xff]  }
  0x5d   :  { %200 = vmatprep.subr.bf16.mxu0 %v791_v16  ;;  %447 = vmatprep.subr.bf16.mxu1 %v812_v23  ;;  %v855_v57 = vld [vmem:[#allocation8 + $0x18] sm:$0xff]   ;;  %v856_v58 = vld [vmem:[#allocation8 + $0x60] sm:$0xff]   ;;  %v858_v60 = vld [vmem:[#allocation8 + $0x68] sm:$0xff]   ;;  %v102_v0 = vsub.s32 0, %v101_v63  ;;  %v106_v2 = vsub.s32 1, %v101_v63 }
  0x5e   :  { %v857_v59 = vld [vmem:[#allocation8 + $0x20] sm:$0xff]   ;;  %v859_v61 = vld [vmem:[#allocation8 + $0x28] sm:$0xff]   ;;  %v98_v1 = vld [vmem:[%s1111_s2] sm:$0x3] }
  0x5f   :  { %v103_v3 = vrot.slane %v98_v1, %v102_v0  ;;  %v107_v4 = vrot.slane %v98_v1, %v106_v2  ;;  %v860_v15 = vld [vmem:[#allocation8 + $0x70] sm:$0xff]   ;;  %v863_v18 = vld [vmem:[#allocation8 + $0x38] sm:$0xff]  }
  0x60   :  { %201 = vmatpush1.bf16.msra.mxu0 %v793_v17  ;;  %448 = vmatpush1.bf16.msra.mxu1 %v814_v26  ;;  %v861_v16 = vld [vmem:[#allocation8 + $0x30] sm:$0xff]   ;;  %v862_v17 = vld [vmem:[#allocation8 + $0x78] sm:$0xff]  }
  0x61   :  { %202 = vmatprep.subr.bf16.mxu0 %v794_v20  ;;  %449 = vmatprep.subr.bf16.mxu1 %v815_v27  ;;  %v267_v19 = vld [vmem:[%s1113_s4] sm:$0x3]  ;;  %s993_s4 = smov [#allocation10]  }
  0x62   :  { %v272_v20 = vrot.slane %v267_v19, %v102_v0  ;;  %s668_s30 = sshll.u32 %s993_s4, 4  ;;  %s669_s30 = int_to_ptr.vmem [resolvable:$true] %s668_s30 }
  0x63   :  { %s954_s8 = scalar_lea.vmem %s669_s30, 128  ;;  %p959_p5 = scmp.lt.s32.totalorder %s669_s30, %s669_s30 }
  0x64   :  { %203 = vmatpush1.bf16.msra.mxu0 %v796_v21  ;;  %450 = vmatpush1.bf16.msra.mxu1 %v817_v29  ;;  %v276_v21 = vrot.slane %v267_v19, %v106_v2  ;;  %p955_p4 = scmp.ne.s32.totalorder %s669_s30, %s954_s8  ;;  %p960_p6 = scmp.lt.s32.totalorder %s954_s8, %s954_s8 }
  0x65   :  { %204 = vmatprep.subr.bf16.mxu0 %v797_v24  ;;  %451 = vmatprep.subr.bf16.mxu1 %v818_v30 }
  0x66   :  { %p961_p7 = por %p960_p6, %p959_p5 }
  0x68   :  { %205 = vmatpush1.bf16.msra.mxu0 %v799_v25  ;;  %452 = vmatpush1.bf16.msra.mxu1 %v820_v31  ;;  %p962_p8 = pnand %p961_p7, %p955_p4 }
  0x69   :  { %453 = vmatprep.subr.bf16.mxu1 %v821_v32  ;;  %744 = vmatprep.subr.bf16.mxu0 %v848_v50 }
  0x6b   :  { %223 = vmatmul.mubr.bf16.vlgmr.msra.gmra.mrb[0].mxu0 %v81_v28 }
  0x6c   :  { %454 = vmatpush1.bf16.msra.mxu1 %v823_v33  ;;  %745 = vmatpush3.bf16.msra.mxu0 %v849_v51  ;;  %v727_v33 = vld [vmem:[%s1115_s6] ss:$0 sm:$0xff] }
  0x6d   :  { %455 = vmatprep.subr.bf16.mxu1 %v824_v34  ;;  %746 = vmatprep.subr.bf16.mxu0 %v850_v52 }
  0x70   :  { %456 = vmatpush1.bf16.msra.mxu1 %v826_v35  ;;  %747 = vmatpush3.bf16.msra.mxu0 %v851_v53 }
  0x71   :  { %457 = vmatprep.subr.bf16.mxu1 %v827_v36  ;;  %748 = vmatprep.subr.bf16.mxu0 %v852_v54 }
  0x74   :  { %458 = vmatpush1.bf16.msra.mxu1 %v829_v37  ;;  %749 = vmatpush3.bf16.msra.mxu0 %v853_v55 }
  0x75   :  { %459 = vmatprep.subr.bf16.mxu1 %v830_v38  ;;  %750 = vmatprep.subr.bf16.mxu0 %v854_v56 }
  0x78   :  { %460 = vmatpush1.bf16.msra.mxu1 %v832_v39  ;;  %751 = vmatpush3.bf16.msra.mxu0 %v855_v57 }
  0x79   :  { %461 = vmatprep.subr.bf16.mxu1 %v833_v40  ;;  %752 = vmatprep.subr.bf16.mxu0 %v856_v58 }
  0x7c   :  { %462 = vmatpush1.bf16.msra.mxu1 %v835_v41  ;;  %753 = vmatpush3.bf16.msra.mxu0 %v857_v59 }
  0x7d   :  { %463 = vmatprep.subr.bf16.mxu1 %v836_v42  ;;  %754 = vmatprep.subr.bf16.mxu0 %v858_v60 }
  0x80   :  { %464 = vmatpush1.bf16.msra.mxu1 %v838_v43  ;;  %755 = vmatpush3.bf16.msra.mxu0 %v859_v61 }
  0x81   :  { %465 = vmatprep.subr.bf16.mxu1 %v839_v44  ;;  %756 = vmatprep.subr.bf16.mxu0 %v860_v15 }
  0x84   :  { %466 = vmatpush1.bf16.msra.mxu1 %v841_v45  ;;  %757 = vmatpush3.bf16.msra.mxu0 %v861_v16 }
  0x85   :  { %467 = vmatprep.subr.bf16.mxu1 %v842_v46  ;;  %758 = vmatprep.subr.bf16.mxu0 %v862_v17 }
  0x88   :  { %468 = vmatpush1.bf16.msra.mxu1 %v844_v47  ;;  %759 = vmatpush3.bf16.msra.mxu0 %v863_v18 }
  0x89   :  { %469 = vmatprep.subr.bf16.mxu1 %v845_v48 }
  0x8c   :  { %470 = vmatpush1.bf16.msra.mxu1 %v847_v49 }
 0x13e   :  { %v224_v5 = vpop.f32.mrb[0].mxu0 }
 0x13f   :  { %v225_v6 = vadd.f32 %v224_v5, %v103_v3  ;;  %v226_v7 = vpop.f32.mrb[1].mxu0 }
 0x140   :  { %v227_v8 = vadd.f32 %v226_v7, %v107_v4  ;;  %v228_v9 = vpop.f32.mrb[2].mxu0 }
 0x141   :  { %v231_v10 = vmax.f32 %v225_v6, 0.0  ;;  %v229_v11 = vpop.f32.mrb[3].mxu0 }
 0x142   :  { %v232_v12 = vmax.f32 %v227_v8, 0.0 }
 0x143   :  { %v233_v14 = vpack.c.bf16 %v231_v10, %v231_v10 }
 0x144   :  { %v234_v13 = vpack.c.bf16 %v232_v12, %v232_v12 }
 0x146   :  { %471 = vmatprep.mubr.bf16.mxu1 %v234_v13 }
 0x147   :  { %472 = vmatmul.mubr.bf16.vlgmr.msra.gmra.mrb[0].mxu1 %v233_v14 }
 0x21a   :  { %v473_v22 = vpop.f32.mrb[0].mxu1 }
 0x21b   :  { %v474_v23 = vadd.f32 %v473_v22, %v272_v20  ;;  %v475_v24 = vpop.f32.mrb[1].mxu1 }
 0x21c   :  { %v476_v25 = vadd.f32 %v475_v24, %v276_v21  ;;  %v477_v26 = vpop.f32.mrb[2].mxu1 }
 0x21d   :  { %v480_v27 = vmax.f32 %v474_v23, 0.0  ;;  %v478_v28 = vpop.f32.mrb[3].mxu1 }
 0x21e   :  { %v481_v29 = vmax.f32 %v476_v25, 0.0 }
 0x21f   :  { %v482_v31 = vpack.c.bf16 %v480_v27, %v480_v27 }
 0x220   :  { %v483_v30 = vpack.c.bf16 %v481_v29, %v481_v29 }
 0x222   :  { %651 = vmatprep.mubr.bf16.mxu0 %v483_v30 }
 0x223   :  { %652 = vmatmul.mubr.bf16.vlgmr.msra.gmra.mrb[4].mxu0 %v482_v31 }
 0x2f6   :  { %v760_v32 = vpop.f32.mrb[4].mxu0 }
 0x2f7   :  { %v761_v34 = vpop.f32.mrb[5].mxu0 }
 0x2f8   :  { %v762_v35 = vadd.f32 %v761_v34, %v760_v32  ;;  %v763_v36 = vpop.f32.mrb[6].mxu0 }
 0x2f9   :  { %v764_v37 = vpop.f32.mrb[7].mxu0 }
 0x2fa   :  { %v654_v38 = vadd.f32 %v762_v35, %v727_v33 }
 0x2fc   :  { %864 = vtanh.f32 %v654_v38 }
 0x306   :  { %v865_v39 = vpop.eup %864 }
 0x307   :  { %v660_v40 = vmul.f32 2.0, %v865_v39 }
 0x309   :  { %661 = vst [vmem:[#allocation10] sm:$0xff] %v660_v40 }
 0x30a   :  { %965 = shalt.err (!%p962_p8)
}
 0x30b   :  { %s966_s10 = scalar_lea.hbm %s1116_s7, 128 }
 0x30c   :  { %p967_p9 = scmp.ne.s32.totalorder %s1116_s7, %s966_s10  ;;  %p970_p10 = scmp.lt.u32.totalorder %s966_s10, %s1116_s7 }
 0x30e   :  { %p972_p11 = pnand %p970_p10, %p967_p9 }
 0x310   :  { %975 = shalt.err (!%p972_p11)
}
 0x311   :  { %671 = dma.vmem_to_hbm [thread:$0]  %s669_s30, 128, %s1116_s7, [#allocation4]  }
 0x312   :  { %982 = dma.done.wait [#allocation4], 128  }
 0x313   :  { %983 = vsyncadd [#allocation4], 4294967168 }
 0x314   :  { %675 = vsyncpa [#allocation3], 1 }
 0x315   :  { %676 = vsyncpa [#allocation6], 1 }
 0x316   :  { %677 = vsyncpa [#allocation9], 1 }
 0x317   :  { %678 = vsyncpa [#allocation4], 1 }

</bundles_post_ra>
